<compile_context>
chip_gen: v7x
topology: tpu7x:2x2x1
jax: 0.10.0
libtpu: 0.0.40
codegen_flags: <defaults>
</compile_context>

<pallas_src>
import math

import jax
import jax.numpy as jnp
from jax.experimental import pallas as pl
from jax.experimental.pallas import tpu as pltpu


def _sigmoid_kernel(v):
    # sigmoid(v) == 0.5 * (tanh(v/2) + 1): one EUP op, no full-precision divide.
    return 0.5 * (jnp.tanh(0.5 * v) + 1.0)


def _sigmoid_ref(v):
    # Matches torch.sigmoid formulation for the plain-JAX reference.
    return 1.0 / (1.0 + jnp.exp(-v))


def _make_notears_kernel(n_lc):
    """n_lc = number of LocallyConnected layers (len(dims) - 2)."""

    def kernel(xT_ref, w1_ref, b1_ref, *rest):
        lc_refs = rest[: 2 * n_lc]
        out_ref = rest[2 * n_lc]

        # fc1_pos(x) - fc1_neg(x) == x @ (Wp - Wn).T + (bp - bn); weight/bias
        # diffs folded in the wrapper.  Batch on the lane axis:
        #   hT = W1 @ xT  ->  [d*m1, bn]  (lane-dense, fp32 accumulation)
        h = jnp.dot(w1_ref[...], xT_ref[...],
                    preferred_element_type=jnp.float32)
        h = h + b1_ref[...]                       # column bias [d*m1, 1]

        # LocallyConnected stack: each layer is ONE matmul against the
        # pre-transposed block-diagonal weight [d*m_out, d*m_in]; off-diagonal
        # blocks are exact zeros so numerics match the per-node formulation.
        # Final layer (m_out == 1) directly yields the [d, bn] output slab,
        # so .squeeze(dim=2) is implicit.
        for l in range(n_lc):
            wT = lc_refs[2 * l][...]              # [d*m_out, d*m_in]
            b = lc_refs[2 * l + 1][...]           # [d*m_out, 1]
            h = _sigmoid_kernel(h)                # slab-wide, fp32
            h = jnp.dot(wT, h.astype(wT.dtype),
                        preferred_element_type=jnp.float32)
            h = h + b

        out_ref[...] = h.astype(out_ref.dtype)

    return kernel


def _padded_block_bytes(shape, dtype):
    """VMEM bytes of one block after (8, 128) tile padding (fp32-conservative)."""
    s = list(shape)
    s[-1] = -(-s[-1] // 128) * 128
    if len(s) >= 2:
        s[-2] = -(-s[-2] // 8) * 8
    return math.prod(s) * jnp.dtype(dtype).itemsize


def _default_batch_tile(n):
    # Prefer a lane-dense (multiple of 128) tile that yields >= 2 grid steps so
    # "parallel" can shard across v7x's two TensorCores; otherwise run the full
    # batch in a single step (fewest serial-loop steps on single-TC v5e/v6e).
    for cand in (512, 384, 256, 128):
        if n >= 2 * cand and n % cand == 0:
            return cand
    return n


def notears_mlp_forward(x, params, dims, *, batch_tile=None,
                        compute_dtype=jnp.float32):
    """Pallas forward of NotearsMLP.

    compute_dtype: dtype of the MXU operands.  jnp.bfloat16 is valid on all
    TPU generations (v5e/v6e/v7x MXUs are bf16-native) and halves x/weight DMA
    and VMEM; accumulation stays fp32 via preferred_element_type.  Biases and
    activations (sigmoid) stay fp32 regardless.
    """
    n, d = x.shape
    assert d == dims[0], "x feature dim must equal dims[0]"
    assert len(dims) >= 2 and dims[-1] == 1, "NotearsMLP requires dims[-1] == 1"
    m1 = dims[1]
    n_lc = len(dims) - 2

    bn = batch_tile if batch_tile is not None else _default_batch_tile(n)
    assert n % bn == 0, "batch must be divisible by batch_tile"
    assert bn == n or bn % 128 == 0, \
        "batch_tile must be the full batch or a multiple of 128 (lane axis)"

    w_pos, b_pos, w_neg, b_neg, lc = params

    # fc1 prep: folded weight/bias diff.  NOTE: folding changes fp32 summation
    # order vs ((x@Wp+bp)-(x@Wn+bn)); differences are ~1e-6, not bit-identical.
    w1 = (w_pos - w_neg).astype(compute_dtype)                 # [d*m1, d]
    b1 = (b_pos - b_neg).reshape(d * m1, 1).astype(jnp.float32)

    # Transpose batch onto the lane axis.
    xT = x.T.astype(compute_dtype)                             # [d, n]

    inputs = [xT, w1, b1]
    in_specs = [
        pl.BlockSpec((d, bn), lambda i: (0, i)),
        pl.BlockSpec((d * m1, d), lambda i: (0, 0)),
        pl.BlockSpec((d * m1, 1), lambda i: (0, 0)),
    ]

    flops = 2 * n * d * (d * m1)
    transcendentals = 0

    # LocallyConnected layers -> pre-transposed block-diagonal weights
    # [d*m_out, d*m_in] (built once here) + column biases [d*m_out, 1].
    # NOTE(scalability): the dense block-diagonal matmul does d x the necessary
    # MACs; fine for small d (d=8 here).  For d >~ 128, tile the LC over node
    # groups instead and/or keep compute_dtype=bf16.
    for (w_l, b_l) in lc:
        _, m_in, m_out = w_l.shape
        eye = jnp.eye(d, dtype=w_l.dtype)
        w_bd = (eye[:, None, :, None] * w_l[:, :, None, :]
                ).reshape(d * m_in, d * m_out)
        w_bd_t = w_bd.T.astype(compute_dtype)                  # [d*m_out, d*m_in]
        b_col = b_l.reshape(d * m_out, 1).astype(jnp.float32)
        inputs += [w_bd_t, b_col]
        in_specs.append(pl.BlockSpec((d * m_out, d * m_in), lambda i: (0, 0)))
        in_specs.append(pl.BlockSpec((d * m_out, 1), lambda i: (0, 0)))
        flops += 2 * n * (d * m_in) * (d * m_out)
        transcendentals += n * d * m_in

    out_dtype = x.dtype
    out_spec = pl.BlockSpec((d, bn), lambda i: (0, i))

    # VMEM budget: blocks (double-buffered by the pipeline) + working slabs;
    # clamp below v7x's 64 MiB physical VMEM.
    block_bytes = sum(_padded_block_bytes(s.block_shape, a.dtype)
                      for s, a in zip(in_specs, inputs))
    block_bytes += _padded_block_bytes((d, bn), out_dtype)
    slab_bytes = _padded_block_bytes((d * max(dims[1:]), bn), jnp.float32)
    vmem_limit = int(min(max(2 * block_bytes + 4 * slab_bytes + (2 << 20),
                             16 << 20), 60 << 20))

    bytes_accessed = sum(int(a.size) * a.dtype.itemsize for a in inputs)
    bytes_accessed += n * d * jnp.dtype(out_dtype).itemsize

    kernel = _make_notears_kernel(n_lc)
    out_t = pl.pallas_call(
        kernel,
        out_shape=jax.ShapeDtypeStruct((d, n), out_dtype),
        grid=(n // bn,),
        in_specs=in_specs,
        out_specs=out_spec,
        compiler_params=pltpu.CompilerParams(
            dimension_semantics=("parallel",),
            vmem_limit_bytes=vmem_limit),
        cost_estimate=pl.CostEstimate(
            flops=int(flops),
            transcendentals=int(transcendentals),
            bytes_accessed=int(bytes_accessed)),
    )(*inputs)

    return out_t.T                                              # [n, d]


def init_params(key, dims):
    """Deterministic synthetic init mirroring the module's parameter shapes."""
    d, m1 = dims[0], dims[1]
    ks = jax.random.split(key, 4 + 2 * (len(dims) - 2))
    bound1 = 1.0 / (d ** 0.5)
    w_pos = jax.random.uniform(ks[0], (d * m1, d), jnp.float32, -bound1, bound1)
    b_pos = jax.random.uniform(ks[1], (d * m1,), jnp.float32, -bound1, bound1)
    w_neg = jax.random.uniform(ks[2], (d * m1, d), jnp.float32, -bound1, bound1)
    b_neg = jax.random.uniform(ks[3], (d * m1,), jnp.float32, -bound1, bound1)
    lc = []
    for l in range(len(dims) - 2):
        m_in, m_out = dims[l + 1], dims[l + 2]
        kw, kb = ks[4 + 2 * l], ks[5 + 2 * l]
        bound = 1.0 / (m_in ** 0.5)
        w_l = jax.random.uniform(kw, (d, m_in, m_out), jnp.float32, -bound, bound)
        b_l = jax.random.uniform(kb, (d, m_out), jnp.float32, -bound, bound)
        lc.append((w_l, b_l))
    return (w_pos, b_pos, w_neg, b_neg, lc)


def notears_mlp_reference(x, params, dims):
    """Plain-JAX reference of the PyTorch forward (for validation)."""
    d, m1 = dims[0], dims[1]
    w_pos, b_pos, w_neg, b_neg, lc = params
    h = (x @ w_pos.T + b_pos) - (x @ w_neg.T + b_neg)
    h = h.reshape(-1, d, m1)
    for (w_l, b_l) in lc:
        h = _sigmoid_ref(h)
        h = jnp.einsum('njm,jmo->njo', h, w_l) + b_l[None]
    return h[..., 0]


# TODO(synk): h_func / l2_reg / fc1_l1_reg / fc1_to_adj (regularizers and the
# trace-expm DAG constraint) are not part of forward() and are not kernelized.

if __name__ == "__main__":
    key = jax.random.PRNGKey(0)
    n = 256  # default tile -> bn=128, grid=2 (shards across v7x's two TCs)

    # canonical NOTEARS-MLP config + a deeper config to exercise n_lc > 1
    for cfg_idx, dims in enumerate(([8, 16, 1], [8, 16, 8, 1])):
        kx, kp = jax.random.split(jax.random.fold_in(key, cfg_idx))
        x = jax.random.normal(kx, (n, dims[0]), jnp.float32)
        params = init_params(kp, dims)
        ref = notears_mlp_reference(x, params, dims)

        # fp32 operand path: tight check.
        out = notears_mlp_forward(x, params, dims)
        out = jax.block_until_ready(out)
        assert out.shape == (n, dims[0])
        assert jnp.allclose(out, ref, atol=1e-5, rtol=1e-5), \
            f"fp32 mismatch vs reference for dims={dims}"

        # bf16 operand path (fp32 accumulation): loose check.
        out_bf16 = notears_mlp_forward(x, params, dims,
                                       compute_dtype=jnp.bfloat16)
        out_bf16 = jax.block_until_ready(out_bf16)
        assert jnp.allclose(out_bf16, ref, atol=5e-2, rtol=5e-2), \
            f"bf16 mismatch vs reference for dims={dims}"

    print("KERNEL_OK")
</pallas_src>

<mosaic_0001>
module attributes {stable_mosaic.version = 11 : i64} {
  func.func @kernel(%arg0: i32, %arg1: memref<8x128xf32, #tpu.memory_space<vmem>>, %arg2: memref<128x8xf32, #tpu.memory_space<vmem>>, %arg3: memref<128x1xf32, #tpu.memory_space<vmem>>, %arg4: memref<8x128xf32, #tpu.memory_space<vmem>>, %arg5: memref<8x1xf32, #tpu.memory_space<vmem>>, %arg6: memref<8x128xf32, #tpu.memory_space<vmem>>) attributes {dimension_semantics = [#tpu.dimension_semantics<parallel>], iteration_bounds = array<i64: 2>, scalar_prefetch = 0 : i64, scratch_operands = 0 : i64, tpu.core_type = #tpu.core_type<tc>, window_params = [{transform_indices = @transform_0, window_bounds = array<i64: 8, 128>}, {pipeline_mode = #tpu.pipeline_mode<synchronous>, transform_indices = @transform_1, window_bounds = array<i64: 128, 8>}, {pipeline_mode = #tpu.pipeline_mode<synchronous>, transform_indices = @transform_2, window_bounds = array<i64: 128, 1>}, {pipeline_mode = #tpu.pipeline_mode<synchronous>, transform_indices = @transform_3, window_bounds = array<i64: 8, 128>}, {pipeline_mode = #tpu.pipeline_mode<synchronous>, transform_indices = @transform_4, window_bounds = array<i64: 8, 1>}, {transform_indices = @transform_5, window_bounds = array<i64: 8, 128>}]} {
    %c0 = arith.constant 0 : index
    %c0_0 = arith.constant 0 : index
    %0 = vector.load %arg2[%c0, %c0_0] : memref<128x8xf32, #tpu.memory_space<vmem>>, vector<128x8xf32>
    %c0_1 = arith.constant 0 : index
    %c0_2 = arith.constant 0 : index
    %1 = vector.load %arg1[%c0_1, %c0_2] : memref<8x128xf32, #tpu.memory_space<vmem>>, vector<8x128xf32>
    %cst = arith.constant dense<0.000000e+00> : vector<128x128xf32>
    %2 = tpu.matmul %0, %1, %cst {dimension_numbers = #tpu.dot_dimension_numbers<[1], [0], [0], [1], [0, 0, 1, 1], [], []>} : vector<128x8xf32>, vector<8x128xf32>, vector<128x128xf32> -> vector<128x128xf32>
    %c0_3 = arith.constant 0 : index
    %c0_4 = arith.constant 0 : index
    %3 = vector.load %arg3[%c0_3, %c0_4] : memref<128x1xf32, #tpu.memory_space<vmem>>, vector<128x1xf32>
    %4 = vector.broadcast %3 : vector<128x1xf32> to vector<128x128xf32>
    %5 = arith.addf %2, %4 : vector<128x128xf32>
    %c0_5 = arith.constant 0 : index
    %c0_6 = arith.constant 0 : index
    %6 = vector.load %arg4[%c0_5, %c0_6] : memref<8x128xf32, #tpu.memory_space<vmem>>, vector<8x128xf32>
    %c0_7 = arith.constant 0 : index
    %c0_8 = arith.constant 0 : index
    %7 = vector.load %arg5[%c0_7, %c0_8] : memref<8x1xf32, #tpu.memory_space<vmem>>, vector<8x1xf32>
    %cst_9 = arith.constant 5.000000e-01 : f32
    %8 = vector.broadcast %cst_9 : f32 to vector<128x128xf32>
    %9 = arith.mulf %8, %5 : vector<128x128xf32>
    %10 = math.tanh %9 : vector<128x128xf32>
    %cst_10 = arith.constant 1.000000e+00 : f32
    %11 = vector.broadcast %cst_10 : f32 to vector<128x128xf32>
    %12 = arith.addf %10, %11 : vector<128x128xf32>
    %cst_11 = arith.constant 5.000000e-01 : f32
    %13 = vector.broadcast %cst_11 : f32 to vector<128x128xf32>
    %14 = arith.mulf %13, %12 : vector<128x128xf32>
    %cst_12 = arith.constant dense<0.000000e+00> : vector<8x128xf32>
    %15 = tpu.matmul %6, %14, %cst_12 {dimension_numbers = #tpu.dot_dimension_numbers<[1], [0], [0], [1], [0, 0, 1, 1], [], []>} : vector<8x128xf32>, vector<128x128xf32>, vector<8x128xf32> -> vector<8x128xf32>
    %16 = vector.broadcast %7 : vector<8x1xf32> to vector<8x128xf32>
    %17 = arith.addf %15, %16 : vector<8x128xf32>
    %c0_13 = arith.constant 0 : index
    %c0_14 = arith.constant 0 : index
    %18 = vector.load %arg6[%c0_13, %c0_14] : memref<8x128xf32, #tpu.memory_space<vmem>>, vector<8x128xf32>
    tpu.vector_store %arg6[%c0_13, %c0_14], %17 {strides = array<i32>} : memref<8x128xf32, #tpu.memory_space<vmem>>, vector<8x128xf32>,
    return
  }
  func.func @transform_0(%arg0: i32) -> (i32, i32) {
    %c0_i32 = arith.constant 0 : i32
    %c0_i32_0 = arith.constant 0 : i32
    return %c0_i32, %arg0 : i32, i32
  }
  func.func @transform_1(%arg0: i32) -> (i32, i32) {
    %c0_i32 = arith.constant 0 : i32
    %c0_i32_0 = arith.constant 0 : i32
    %c0_i32_1 = arith.constant 0 : i32
    return %c0_i32, %c0_i32_0 : i32, i32
  }
  func.func @transform_2(%arg0: i32) -> (i32, i32) {
    %c0_i32 = arith.constant 0 : i32
    %c0_i32_0 = arith.constant 0 : i32
    %c0_i32_1 = arith.constant 0 : i32
    return %c0_i32, %c0_i32_0 : i32, i32
  }
  func.func @transform_3(%arg0: i32) -> (i32, i32) {
    %c0_i32 = arith.constant 0 : i32
    %c0_i32_0 = arith.constant 0 : i32
    %c0_i32_1 = arith.constant 0 : i32
    return %c0_i32, %c0_i32_0 : i32, i32
  }
  func.func @transform_4(%arg0: i32) -> (i32, i32) {
    %c0_i32 = arith.constant 0 : i32
    %c0_i32_0 = arith.constant 0 : i32
    %c0_i32_1 = arith.constant 0 : i32
    return %c0_i32, %c0_i32_0 : i32, i32
  }
  func.func @transform_5(%arg0: i32) -> (i32, i32) {
    %c0_i32 = arith.constant 0 : i32
    %c0_i32_0 = arith.constant 0 : i32
    return %c0_i32, %arg0 : i32, i32
  }
}

</mosaic_0001>

<bundles_post_ra>
// kernel: tpu_custom_call.1
= control target key start
LH: loop header
LB: loop body
LE: loop exit
PB: predicated region body
PF: predicated region fallthrough
CT: control target
= control target key end

     0   :  { %10 = vsyncpa [#allocation3], 0  ;;  %s1289_s0 = inlined_call_operand.vmem [shape: f32[8,256], index: 0, kind: input, shape index: {}]   ;;  %s1290_s1 = inlined_call_operand.vmem [shape: f32[128,8], index: 1, kind: input, shape index: {}]   ;;  %s1291_s2 = inlined_call_operand.vmem [shape: f32[128,1], index: 2, kind: input, shape index: {}]   ;;  %s1292_s3 = inlined_call_operand.vmem [shape: f32[8,128], index: 3, kind: input, shape index: {}]   ;;  %s1293_s4 = inlined_call_operand.vmem [shape: f32[8,1], index: 4, kind: input, shape index: {}]   ;;  %s1294_s5 = inlined_call_operand.hbm [shape: f32[8,256], index: 5, kind: output, shape index: {}]  }
   0x1   :  { %12 = vsyncpa [#allocation3 + $0x1], 0  ;;  %s1063_s18 = smov 0   ;;  %s1065_s19 = smov 0  }
   0x2   :  { %s1067_s20 = smov 0   ;;  %s1069_s21 = smov 0  }
   0x3 LB: > { %s1084_s22 = sadd.s32 4294967295, %s1026_s21   ;;  %s742_s23 = sadd.s32 4294967294, %s1026_s21   ;;  %s1026_s21 = sphi %s1069_s21, %s1300_s21   ;;  %s1022_s20 = sphi %s1067_s20, %s1299_s20   ;;  %s1018_s19 = sphi %s1065_s19, %s1298_s19   ;;  %s1014_s18 = sphi %s1063_s18, %s1297_s18  }
   0x4   : > { %s1088_s24 = sadd.s32 1, %s1026_s21   ;;  %s135_s25 = sadd.s32 1, %s1022_s20 }
   0x5   : > { %s132_s26 = ssub.s32 %s1026_s21, %s1088_s24  ;;  %p145_p0 = scmp.ne.s32.totalorder %s1022_s20, %s1018_s19 }
   0x6   : > { %p133_p1 = scmp.eq.s32.totalorder %s132_s26, 0  ;;  %p146_p2 = scmp.eq.s32.totalorder %s1084_s22, 1 }
   0x7   : > { %p151_p3 = scmp.ne.s32.totalorder %s1018_s19, %s1014_s18  ;;  %p152_p4 = scmp.eq.s32.totalorder %s742_s23, 1 }
   0x8   : > { %s1099_s27 = scalar_select %p133_p1, %s1022_s20, %s135_s25  }
   0x9   : > { %p1101_p5 = por %p146_p2, %p145_p0  ;;  %p1105_p6 = por %p152_p4, %p151_p3 }
   0xa   : > { %p745_p7 = scmp.ge.s32.totalorder %s1026_s21, 1  ;;  %p189_p8 = scmp.lt.s32.totalorder %s1026_s21, 3 }
   0xc   : > { %p190_p9 = pnand %p745_p7, %p189_p8 }
   0xd   : > { %p216_p10 = scmp.lt.s32.totalorder (!%p190_p9), %s1084_s22, 1  ;;  %v220_v0 = vld [vmem:[%s1290_s1] sm:$0xff] (!%p190_p9)  ;;  %vm333_vm0 = vcmask (!%p190_p9), 64512   ;;  %v1028_v1 = vmov (!%p190_p9), 0   ;;  %v221_v4 = vld [vmem:[%s1290_s1 + $0x8] sm:$0xff] (!%p190_p9)  ;;  %v239_v5 = vld [vmem:[%s1291_s2 + $0x10] sm:$0xff] (!%p190_p9) }
   0xe   : > { %193 = sbr.rel (%p190_p9) target bundleno = 521 (0x209), region = 40  ;;  %804 = vmatprep.mubr.msk.f32.mxu0 (!%p190_p9), %vm333_vm0, %v220_v0  ;;  %930 = vset.pattern.permute.xlu0 (!%p190_p9), %v1028_v1  ;;  %v237_v2 = vld [vmem:[%s1291_s2] sm:$0xff] (!%p190_p9)  ;;  %v222_v6 = vld [vmem:[%s1290_s1 + $0x10] sm:$0xff] (!%p190_p9)  ;;  %v238_v7 = vld [vmem:[%s1291_s2 + $0x8] sm:$0xff] (!%p190_p9)  ;;  %v1029_v35 = vmov (!%p190_p9), 0.0|0.0   ;;  %vm1030_vm1 = vmmov (!%p190_p9), 0  }
   0xf   : > { %931 = vset.pattern.permute.xlu1 (!%p190_p9), %v1028_v1  ;;  %255 = vperm.xlu0 (!%p190_p9), %930, %v237_v2   ;;  %v240_v8 = vld [vmem:[%s1291_s2 + $0x18] sm:$0xff] (!%p190_p9)  ;;  %v224_v10 = vld [vmem:[%s1290_s1 + $0x20] sm:$0xff] (!%p190_p9)  ;;  %v242_v12 = vld [vmem:[%s1291_s2 + $0x28] sm:$0xff] (!%p190_p9)  ;;  %v1031_v36 = vmov (!%p190_p9), 0.0   ;;  %s213_s14 = sand.u32 (!%p190_p9), 1, %s1018_s19   ;;  %s765_s16 = sshll.u32 (!%p190_p9), %s1084_s22, 7 }
  0x10   : > { %265 = vperm.xlu1 (!%p190_p9), %931, %v239_v5   ;;  %v223_v9 = vld [vmem:[%s1290_s1 + $0x18] sm:$0xff] (!%p190_p9)  ;;  %v241_v11 = vld [vmem:[%s1291_s2 + $0x20] sm:$0xff] (!%p190_p9)  ;;  %v225_v13 = vld [vmem:[%s1290_s1 + $0x28] sm:$0xff] (!%p190_p9)  ;;  %863 = vmatprep.subr.bf16.mxu1 (!%p190_p9), %v1029_v35  ;;  %s746_s15 = sshll.u32 (!%p190_p9), %s213_s14, 3  ;;  %s1247_s30 = scalar_lea.hbm (!%p190_p9), %s1294_s5, %s765_s16 }
  0x11   : > { %v226_v14 = vld [vmem:[%s1290_s1 + $0x30] sm:$0xff] (!%p190_p9)  ;;  %v244_v16 = vld [vmem:[%s1291_s2 + $0x38] sm:$0xff] (!%p190_p9)  ;;  %v228_v18 = vld [vmem:[%s1290_s1 + $0x40] sm:$0xff] (!%p190_p9)  ;;  %860 = vmatprep.mubr.msk.f32.mxu1 (!%p190_p9), %vm1030_vm1, %v1031_v36  ;;  %s215_s17 = scalar_lea.vmem (!%p190_p9), [#allocation2], %s746_s15  ;;  %s670_s6 = scalar_lea.sflag (!%p190_p9), [#allocation3], %s213_s14 }
  0x12   : > { %v243_v15 = vld [vmem:[%s1291_s2 + $0x30] sm:$0xff] (!%p190_p9)  ;;  %v227_v17 = vld [vmem:[%s1290_s1 + $0x38] sm:$0xff] (!%p190_p9)  ;;  %v245_v19 = vld [vmem:[%s1291_s2 + $0x40] sm:$0xff] (!%p190_p9)  ;;  %s683_s23 = sshll.u32 (!%p190_p9), %s215_s17, 4  ;;  %s1249_s23 = int_to_ptr.vmem [resolvable:$true] %s683_s23 }
  0x13   : > { %260 = vperm.xlu0 (!%p190_p9), %930, %v238_v7   ;;  %v246_v20 = vld [vmem:[%s1291_s2 + $0x48] sm:$0xff] (!%p190_p9)  ;;  %v230_v22 = vld [vmem:[%s1290_s1 + $0x50] sm:$0xff] (!%p190_p9)  ;;  %v248_v24 = vld [vmem:[%s1291_s2 + $0x58] sm:$0xff] (!%p190_p9) }
  0x14   : > { %270 = vperm.xlu1 (!%p190_p9), %931, %v240_v8   ;;  %v229_v21 = vld [vmem:[%s1290_s1 + $0x48] sm:$0xff] (!%p190_p9)  ;;  %v247_v23 = vld [vmem:[%s1291_s2 + $0x50] sm:$0xff] (!%p190_p9)  ;;  %v231_v25 = vld [vmem:[%s1290_s1 + $0x58] sm:$0xff] (!%p190_p9) }
  0x15   : > { %s217_s7 = scalar_select %p216_p10, %s1084_s22, 1  ;;  %v232_v26 = vld [vmem:[%s1290_s1 + $0x60] sm:$0xff]  ;;  %v250_v28 = vld [vmem:[%s1291_s2 + $0x68] sm:$0xff]  ;;  %v234_v30 = vld [vmem:[%s1290_s1 + $0x70] sm:$0xff] }
  0x16   : > { %v249_v27 = vld [vmem:[%s1291_s2 + $0x60] sm:$0xff]  ;;  %v233_v29 = vld [vmem:[%s1290_s1 + $0x68] sm:$0xff]  ;;  %v251_v31 = vld [vmem:[%s1291_s2 + $0x70] sm:$0xff]  ;;  %s1032_s22 = smov [#allocation2]  }
  0x17   : > { %s747_s8 = sshll.u32 %s217_s7, 3  ;;  %275 = vperm.xlu0 %930, %v241_v11   ;;  %v252_v32 = vld [vmem:[%s1291_s2 + $0x78] sm:$0xff]  ;;  %v528_v34 = vld [vmem:[%s1293_s4] sm:$0xff]  ;;  %s964_s7 = scalar_lea.vmem %s1249_s23, 128 }
  0x18   : > { %s219_s11 = scalar_lea.vmem %s1289_s0, %s747_s8  ;;  %280 = vperm.xlu1 %931, %v242_v12   ;;  %v235_v33 = vld [vmem:[%s1290_s1 + $0x78] sm:$0xff]  ;;  %p965_p11 = scmp.ne.s32.totalorder %s1249_s23, %s964_s7 }
  0x19   : > { %v236_v3 = vld [vmem:[%s219_s11] sm:$0xff]  ;;  %s968_s8 = sshll.u32 %s1032_s22, 4  ;;  %s969_s8 = int_to_ptr.vmem [resolvable:$false] %s968_s8 }
  0x1a   : > { %802 = vmatprep.subr.mxu0 %v236_v3  ;;  %p966_p12 = pnand %p965_p11, %p1101_p5  ;;  %s970_s9 = scalar_lea.vmem %s969_s8, 256 }
  0x1b   : > { %803 = vmatpush3.msra.mxu0 %v236_v3  ;;  %285 = vperm.xlu0 %930, %v243_v15   ;;  %p971_p0 = scmp.lt.s32.totalorder %s1249_s23, %s969_s8  ;;  %p972_p1 = scmp.lt.s32.totalorder %s970_s9, %s964_s7 }
  0x1c   : > { %805 = vmatmul.mubr.msk.f32.vlgmr.msra.gmra.mrb[0].mxu0 %vm333_vm0, %v221_v4  ;;  %290 = vperm.xlu1 %931, %v244_v16   ;;  %p967_p13 = pneg %p966_p12 }
  0x1d   : > { %807 = vmatprep.mubr.msk.f32.mxu0 %vm333_vm0, %v222_v6  ;;  %p973_p2 = por %p972_p1, %p971_p0 }
  0x1f   : > { %295 = vperm.xlu0 %930, %v245_v19   ;;  %p974_p3 = pnand %p973_p2, %p967_p13 }
  0x20   : > { %808 = vmatmul.mubr.msk.f32.gmra.mrb[2].mxu0 %vm333_vm0, %v223_v9  ;;  %300 = vperm.xlu1 %931, %v246_v20  }
  0x21   : > { %810 = vmatprep.mubr.msk.f32.mxu0 %vm333_vm0, %v224_v10 }
  0x23   : > { %305 = vperm.xlu0 %930, %v247_v23  }
  0x24   : > { %811 = vmatmul.mubr.msk.f32.gmra.mrb[4].mxu0 %vm333_vm0, %v225_v13  ;;  %310 = vperm.xlu1 %931, %v248_v24  }
  0x25   : > { %813 = vmatprep.mubr.msk.f32.mxu0 %vm333_vm0, %v226_v14 }
  0x27   : > { %315 = vperm.xlu0 %930, %v249_v27  }
  0x28   : > { %814 = vmatmul.mubr.msk.f32.gmra.mrb[6].mxu0 %vm333_vm0, %v227_v17  ;;  %320 = vperm.xlu1 %931, %v250_v28  }
  0x29   : > { %816 = vmatprep.mubr.msk.f32.mxu0 %vm333_vm0, %v228_v18 }
  0x2b   : > { %325 = vperm.xlu0 %930, %v251_v31  }
  0x2c   : > { %817 = vmatmul.mubr.msk.f32.gmra.mrb[8].mxu0 %vm333_vm0, %v229_v21  ;;  %330 = vperm.xlu1 %931, %v252_v32  }
  0x2d   : > { %819 = vmatprep.mubr.msk.f32.mxu0 %vm333_vm0, %v230_v22 }
  0x2f   : > { %595 = vperm.xlu0 %930, %v528_v34  }
  0x30   : > { %820 = vmatmul.mubr.msk.f32.gmra.mrb[10].mxu0 %vm333_vm0, %v231_v25 }
  0x31   : > { %822 = vmatprep.mubr.msk.f32.mxu0 %vm333_vm0, %v232_v26 }
  0x34   : > { %823 = vmatmul.mubr.msk.f32.gmra.mrb[12].mxu0 %vm333_vm0, %v233_v29 }
  0x35   : > { %825 = vmatprep.mubr.msk.f32.mxu0 %vm333_vm0, %v234_v30 }
  0x38   : > { %826 = vmatmul.mubr.msk.f32.gmra.mrb[14].mxu0 %vm333_vm0, %v235_v33 }
  0x8e   : > { %v256_v38 = vpop.permute.xlu0 %255 }
  0x8f   : > { %v266_v37 = vpop.permute.xlu1 %265 }
  0x92   : > { %v261_v40 = vpop.permute.xlu0 %260 }
  0x93   : > { %v271_v39 = vpop.permute.xlu1 %270 }
  0x96   : > { %v276_v42 = vpop.permute.xlu0 %275 }
  0x97   : > { %v281_v41 = vpop.permute.xlu1 %280 }
  0x9a   : > { %v286_v51 = vpop.permute.xlu0 %285 }
  0x9b   : > { %v291_v48 = vpop.permute.xlu1 %290 }
  0x9e   : > { %v296_v62 = vpop.permute.xlu0 %295 }
  0x9f   : > { %v301_v60 = vpop.permute.xlu1 %300 }
  0xa2   : > { %v306_v12 = vpop.permute.xlu0 %305 }
  0xa3   : > { %v311_v8 = vpop.permute.xlu1 %310 }
  0xa6   : > { %v316_v33 = vpop.permute.xlu0 %315 }
  0xa7   : > { %v321_v29 = vpop.permute.xlu1 %320 }
  0xef   : > { %v806_v43 = vpop.f32.mrb[0].mxu0 }
  0xf0   : > { %v454_v44 = vadd.f32 %v806_v43, %v261_v40  ;;  %v448_v45 = vpop.f32.mrb[1].mxu0 }
  0xf1   : > { %v449_v46 = vadd.f32 %v448_v45, %v256_v38 }
  0xf2   : > { %v530_v47 = vmul.f32 0.5, %v454_v44 }
  0xf3   : > { %v529_v49 = vmul.f32 0.5, %v449_v46  ;;  %v809_v50 = vpop.f32.mrb[2].mxu0 }
  0xf4   : > { %932 = vtanh.f32 %v530_v47  ;;  %v464_v52 = vadd.f32 %v809_v50, %v271_v39  ;;  %v458_v53 = vpop.f32.mrb[3].mxu0 }
  0xf5   : > { %934 = vtanh.f32 %v529_v49  ;;  %v459_v54 = vadd.f32 %v458_v53, %v266_v37 }
  0xf6   : > { %v532_v55 = vmul.f32 0.5, %v464_v52 }
  0xf7   : > { %v531_v56 = vmul.f32 0.5, %v459_v54  ;;  %v812_v57 = vpop.f32.mrb[4].mxu0 }
  0xf8   : > { %936 = vtanh.f32 %v532_v55  ;;  %v474_v58 = vadd.f32 %v812_v57, %v281_v41  ;;  %v468_v59 = vpop.f32.mrb[5].mxu0  ;;  %v326_v55 = vpop.permute.xlu0 %325 }
  0xf9   : > { %938 = vtanh.f32 %v531_v56  ;;  %v469_v61 = vadd.f32 %v468_v59, %v276_v42 }
  0xfa   : > { %v534_v63 = vmul.f32 0.5, %v474_v58 }
  0xfb   : > { %v533_v0 = vmul.f32 0.5, %v469_v61  ;;  %v815_v1 = vpop.f32.mrb[6].mxu0 }
  0xfc   : > { %940 = vtanh.f32 %v534_v63  ;;  %v484_v2 = vadd.f32 %v815_v1, %v291_v48  ;;  %v478_v3 = vpop.f32.mrb[7].mxu0 }
  0xfd   : > { %942 = vtanh.f32 %v533_v0  ;;  %v479_v4 = vadd.f32 %v478_v3, %v286_v51  ;;  %v331_v51 = vpop.permute.xlu1 %330 }
  0xfe   : > { %v933_v5 = vpop.eup %932  ;;  %v536_v6 = vmul.f32 0.5, %v484_v2 }
  0xff   : > { %v935_v7 = vpop.eup %934  ;;  %v535_v9 = vmul.f32 0.5, %v479_v4  ;;  %v818_v10 = vpop.f32.mrb[8].mxu0  ;;  %v562_v11 = vadd.f32 1.0, %v933_v5 }
 0x100   : > { %944 = vtanh.f32 %v536_v6  ;;  %v494_v13 = vadd.f32 %v818_v10, %v301_v60  ;;  %v488_v14 = vpop.f32.mrb[9].mxu0  ;;  %v561_v15 = vadd.f32 1.0, %v935_v7 }
 0x101   : > { %946 = vtanh.f32 %v535_v9  ;;  %v489_v16 = vadd.f32 %v488_v14, %v296_v62  ;;  %v578_v17 = vmul.f32 0.5, %v562_v11 }
 0x102   : > { %v937_v18 = vpop.eup %936  ;;  %v538_v19 = vmul.f32 0.5, %v494_v13  ;;  %v577_v20 = vmul.f32 0.5, %v561_v15 }
 0x103   : > { %v939_v21 = vpop.eup %938  ;;  %v564_v22 = vadd.f32 1.0, %v937_v18  ;;  %v537_v23 = vmul.f32 0.5, %v489_v16  ;;  %v821_v24 = vpop.f32.mrb[10].mxu0 }
 0x104   : > { %v563_v25 = vadd.f32 1.0, %v939_v21  ;;  %948 = vtanh.f32 %v538_v19  ;;  %v504_v26 = vadd.f32 %v821_v24, %v311_v8  ;;  %v498_v27 = vpop.f32.mrb[11].mxu0  ;;  %v864_v28 = vpack.c.bf16 %v578_v17, %v577_v20 }
 0x105   : > { %v580_v30 = vmul.f32 0.5, %v564_v22  ;;  %950 = vtanh.f32 %v537_v23  ;;  %v499_v31 = vadd.f32 %v498_v27, %v306_v12 }
 0x106   : > { %v941_v32 = vpop.eup %940  ;;  %v579_v34 = vmul.f32 0.5, %v563_v25  ;;  %v540_v36 = vmul.f32 0.5, %v504_v26  ;;  %865 = vmatpush3.bf16.msra.mxu1 %v864_v28 }
 0x107   : > { %v943_v37 = vpop.eup %942  ;;  %v566_v38 = vadd.f32 1.0, %v941_v32  ;;  %v539_v39 = vmul.f32 0.5, %v499_v31  ;;  %v824_v40 = vpop.f32.mrb[12].mxu0  ;;  %866 = vmatprep.subr.bf16.mxu1 %v1029_v35 }
 0x108   : > { %v565_v41 = vadd.f32 1.0, %v943_v37  ;;  %952 = vtanh.f32 %v540_v36  ;;  %v514_v42 = vadd.f32 %v824_v40, %v321_v29  ;;  %v508_v43 = vpop.f32.mrb[13].mxu0  ;;  %v867_v44 = vpack.c.bf16 %v580_v30, %v579_v34  ;;  %v527_v30 = vld [vmem:[%s1292_s3] sm:$0xff]  ;;  %v596_v31 = vpop.permute.xlu0 %595 }
 0x109   : > { %v582_v45 = vmul.f32 0.5, %v566_v38  ;;  %954 = vtanh.f32 %v539_v39  ;;  %v509_v46 = vadd.f32 %v508_v43, %v316_v33 }
 0x10a   : > { %v945_v47 = vpop.eup %944  ;;  %v581_v48 = vmul.f32 0.5, %v565_v41  ;;  %v542_v49 = vmul.f32 0.5, %v514_v42  ;;  %868 = vmatpush3.bf16.msra.mxu1 %v867_v44 }
 0x10b   : > { %v947_v50 = vpop.eup %946  ;;  %v568_v52 = vadd.f32 1.0, %v945_v47  ;;  %v541_v53 = vmul.f32 0.5, %v509_v46  ;;  %v827_v54 = vpop.f32.mrb[14].mxu0  ;;  %869 = vmatprep.subr.bf16.mxu1 %v1029_v35 }
 0x10c   : > { %v567_v56 = vadd.f32 1.0, %v947_v50  ;;  %956 = vtanh.f32 %v542_v49  ;;  %v524_v57 = vadd.f32 %v827_v54, %v331_v51  ;;  %v518_v58 = vpop.f32.mrb[15].mxu0  ;;  %v870_v59 = vpack.c.bf16 %v582_v45, %v581_v48 }
 0x10d   : > { %v584_v60 = vmul.f32 0.5, %v568_v52  ;;  %958 = vtanh.f32 %v541_v53  ;;  %v519_v61 = vadd.f32 %v518_v58, %v326_v55 }
 0x10e   : > { %v949_v62 = vpop.eup %948  ;;  %v583_v63 = vmul.f32 0.5, %v567_v56  ;;  %v544_v0 = vmul.f32 0.5, %v524_v57  ;;  %871 = vmatpush3.bf16.msra.mxu1 %v870_v59 }
 0x10f   : > { %v951_v1 = vpop.eup %950  ;;  %v570_v2 = vadd.f32 1.0, %v949_v62  ;;  %v543_v3 = vmul.f32 0.5, %v519_v61  ;;  %872 = vmatprep.subr.bf16.mxu1 %v1029_v35 }
 0x110   : > { %v569_v4 = vadd.f32 1.0, %v951_v1  ;;  %960 = vtanh.f32 %v544_v0  ;;  %v873_v5 = vpack.c.bf16 %v584_v60, %v583_v63 }
 0x111   : > { %v586_v6 = vmul.f32 0.5, %v570_v2  ;;  %962 = vtanh.f32 %v543_v3 }
 0x112   : > { %v953_v7 = vpop.eup %952  ;;  %v585_v8 = vmul.f32 0.5, %v569_v4  ;;  %874 = vmatpush3.bf16.msra.mxu1 %v873_v5 }
 0x113   : > { %v955_v9 = vpop.eup %954  ;;  %v572_v10 = vadd.f32 1.0, %v953_v7  ;;  %875 = vmatprep.subr.bf16.mxu1 %v1029_v35 }
 0x114   : > { %v571_v11 = vadd.f32 1.0, %v955_v9  ;;  %v876_v12 = vpack.c.bf16 %v586_v6, %v585_v8 }
 0x115   : > { %v588_v13 = vmul.f32 0.5, %v572_v10 }
 0x116   : > { %v957_v14 = vpop.eup %956  ;;  %v587_v15 = vmul.f32 0.5, %v571_v11  ;;  %877 = vmatpush3.bf16.msra.mxu1 %v876_v12 }
 0x117   : > { %v959_v16 = vpop.eup %958  ;;  %v574_v17 = vadd.f32 1.0, %v957_v14  ;;  %878 = vmatprep.subr.bf16.mxu1 %v1029_v35 }
 0x118   : > { %v573_v18 = vadd.f32 1.0, %v959_v16  ;;  %v879_v19 = vpack.c.bf16 %v588_v13, %v587_v15 }
 0x119   : > { %v590_v20 = vmul.f32 0.5, %v574_v17 }
 0x11a   : > { %v961_v21 = vpop.eup %960  ;;  %v589_v22 = vmul.f32 0.5, %v573_v18  ;;  %880 = vmatpush3.bf16.msra.mxu1 %v879_v19 }
 0x11b   : > { %v963_v23 = vpop.eup %962  ;;  %v576_v24 = vadd.f32 1.0, %v961_v21  ;;  %881 = vmatprep.subr.bf16.mxu1 %v1029_v35 }
 0x11c   : > { %v575_v25 = vadd.f32 1.0, %v963_v23  ;;  %v882_v26 = vpack.c.bf16 %v590_v20, %v589_v22 }
 0x11d   : > { %v592_v27 = vmul.f32 0.5, %v576_v24 }
 0x11e   : > { %v591_v28 = vmul.f32 0.5, %v575_v25  ;;  %883 = vmatpush3.bf16.msra.mxu1 %v882_v26 }
 0x11f   : > { %884 = vmatprep.subr.bf16.mxu1 %v1029_v35 }
 0x120   : > { %v885_v29 = vpack.c.bf16 %v592_v27, %v591_v28 }
 0x122   : > { %886 = vmatpush3.bf16.msra.mxu1 %v885_v29 }
 0x125   : > { %861 = vmatmul.mubr.f32.vlgmr.msra.gmra.mrb[0].mxu1 %v527_v30 }
 0x1f8   : > { %v664_v32 = vpop.f32.mrb[0].mxu1 }
 0x1f9   : > { %v665_v33 = vadd.f32 %v664_v32, %v596_v31  ;;  %v862_v34 = vpop.f32.mrb[1].mxu1 }
 0x1fb   : > { %668 = vst [vmem:[%s215_s17] sm:$0xff] %v665_v33 }
 0x1fc   : > { %977 = shalt.err (!%p974_p3)
}
 0x1fd   : > { %s978_s10 = scalar_lea.hbm %s1247_s30, 128  ;;  %s982_s13 = scalar_lea.hbm %s1294_s5, 256 }
 0x1fe   : > { %p979_p4 = scmp.ne.s32.totalorder %s1247_s30, %s978_s10  ;;  %p983_p9 = scmp.lt.u32.totalorder %s1247_s30, %s1294_s5 }
 0x1ff   : > { %p984_p10 = scmp.lt.u32.totalorder %s982_s13, %s978_s10  ;;  %p986_p12 = scmp.lt.u32.totalorder %s978_s10, %s1247_s30 }
 0x200   : > { %p980_p7 = pnand %p979_p4, %p1101_p5 }
 0x201   : > { %p985_p11 = por %p984_p10, %p983_p9 }
 0x202   : > { %p981_p8 = pneg %p980_p7 }
 0x203   : > { %p987_p13 = por %p986_p12, %p985_p11 }
 0x205   : > { %p988_p0 = pnand %p987_p13, %p981_p8 }
 0x207   : > { %991 = shalt.err (!%p988_p0)
}
 0x208   : > { %887 = dma.vmem_to_hbm [thread:$0]  (%p1101_p5), %s1249_s23, 128, %s1247_s30, %s670_s6  }
 0x209 PF: > { %p893_p1 = scmp.ge.s32.totalorder %s1026_s21, 2  ;;  %s695_s16 = sand.u32 1, %s1014_s18  }
 0x20a   : > { %s696_s17 = scalar_lea.sflag [#allocation3], %s695_s16 }
 0x20b   : > { %p890_p2 = pnand %p893_p1, %p1105_p6 }
 0x20d   : > { %1009 = dma.done.wait (!%p890_p2), %s696_s17, 128  }
 0x20e   : > { %1011 = vsyncadd (!%p890_p2), %s696_s17, 4294967168  ;;  %p15_p3 = scmp.ge.s32.totalorder %s1088_s24, 4   ;;  %s1297_s18 = smov %s1018_s19 }
 0x20f   : > { %s1298_s19 = smov %s1022_s20  ;;  %s1299_s20 = smov %s1099_s27 }
 0x210   : > { %s1300_s21 = smov %s1088_s24  ;;  %17 = sbr.rel (!%p15_p3) target bundleno = 3 (0x3), region = 75 }
 0x217   :  { %701 = vsyncpa [#allocation3], 1 }
 0x218   :  { %703 = vsyncpa [#allocation3 + $0x1], 1 }

</bundles_post_ra>
